<compile_context>
chip_gen: v7x
topology: tpu7x:2x2x1
jax: 0.10.0
libtpu: 0.0.40
codegen_flags: <defaults>
</compile_context>

<pallas_src>
import math

import jax
import jax.numpy as jnp
import numpy as np
from jax.experimental import pallas as pl
from jax.experimental.pallas import tpu as pltpu

LANE = 128


# ---------------------------------------------------------------------------
# Pallas kernel: y = (x @ W1 + b1) @ W2 + b2   (W2/b2 already lane-padded)
# ---------------------------------------------------------------------------
def _two_layer_kernel(x_ref, w1_ref, b1_ref, w2_ref, b2_ref, o_ref):
    h = jnp.dot(x_ref[...], w1_ref[...], preferred_element_type=jnp.float32)
    h = h + b1_ref[...]
    y = jnp.dot(h, w2_ref[...], preferred_element_type=jnp.float32)
    y = y + b2_ref[...]
    o_ref[...] = y.astype(o_ref.dtype)


def two_layer_linear(x2d, w1, b1, w2p, b2p, *, tm=512):
    """x2d: (M, d_model) f32, w1: (d_model, d_model), w2p: (d_model, d_out_p)
    with d_out_p a multiple of 128.  Returns (M, d_out_p) f32."""
    M, d_model = x2d.shape
    d_out_p = w2p.shape[1]

    # Large M tile; if M is smaller than the tile, use the full extent
    # (block dim == full array dim is always a legal block shape).
    tm_eff = min(tm, M)
    grid = (pl.cdiv(M, tm_eff),)

    out = pl.pallas_call(
        _two_layer_kernel,
        out_shape=jax.ShapeDtypeStruct((M, d_out_p), jnp.float32),
        grid=grid,
        in_specs=[
            pl.BlockSpec((tm_eff, d_model), lambda i: (i, 0)),    # activations
            pl.BlockSpec((d_model, d_model), lambda i: (0, 0)),   # W1 (resident)
            pl.BlockSpec((1, d_model), lambda i: (0, 0)),         # b1
            pl.BlockSpec((d_model, d_out_p), lambda i: (0, 0)),   # W2 (lane-padded)
            pl.BlockSpec((1, d_out_p), lambda i: (0, 0)),         # b2 (lane-padded)
        ],
        out_specs=pl.BlockSpec((tm_eff, d_out_p), lambda i: (i, 0)),
        compiler_params=pltpu.CompilerParams(
            dimension_semantics=("parallel",),
            vmem_limit_bytes=64 * 1024 * 1024,
        ),
    )(x2d, w1, b1.reshape(1, d_model), w2p, b2p.reshape(1, d_out_p))
    return out


# ---------------------------------------------------------------------------
# Module (mirrors the PyTorch `TemporalOutput`)
# ---------------------------------------------------------------------------
class TemporalOutput:
    def __init__(self, col, data_info, label_encoder_dict, d_model, key):
        if col in data_info.processing_info['scaling_cols']:
            d_out = 1
        elif col in data_info.processing_info['embedding_cols']:
            d_out = label_encoder_dict[col].get_num_cls()
        else:
            raise ValueError(f"column {col!r} is neither scaling nor embedding")
        self.d_model = d_model
        self.d_out = d_out

        # Deterministic PyTorch-style init: U(-1/sqrt(fan_in), 1/sqrt(fan_in)).
        k1, k2, k3, k4 = jax.random.split(key, 4)
        bound = 1.0 / math.sqrt(d_model)
        self.w1 = jax.random.uniform(k1, (d_model, d_model), jnp.float32, -bound, bound)
        self.b1 = jax.random.uniform(k2, (d_model,), jnp.float32, -bound, bound)
        self.w2 = jax.random.uniform(k3, (d_model, d_out), jnp.float32, -bound, bound)
        self.b2 = jax.random.uniform(k4, (d_out,), jnp.float32, -bound, bound)

        # Pad the second projection's output axis to >=128 lanes ONCE so the
        # kernel stores are lane-dense (unmasked vst).  Padding columns are
        # zero weight + zero bias, sliced away in forward().
        self.d_out_p = max(LANE, ((d_out + LANE - 1) // LANE) * LANE)
        self.w2p = jnp.pad(self.w2, ((0, 0), (0, self.d_out_p - d_out)))
        self.b2p = jnp.pad(self.b2, (0, self.d_out_p - d_out))

    def forward(self, key, val):
        # val: (..., d_model) -> (..., d_out).  `key` (column name) is unused,
        # kept for API parity with the PyTorch forward signature.
        lead = val.shape[:-1]
        M = 1
        for s in lead:
            M *= int(s)
        x2d = val.reshape(M, self.d_model).astype(jnp.float32)
        out = two_layer_linear(x2d, self.w1, self.b1, self.w2p, self.b2p)
        return out[:, :self.d_out].reshape(*lead, self.d_out)

    __call__ = forward


# ---------------------------------------------------------------------------
# Minimal stand-ins for data_info / label_encoder_dict
# ---------------------------------------------------------------------------
class DataInfo:
    def __init__(self):
        self.processing_info = {
            'scaling_cols': ['price'],
            'embedding_cols': ['category'],
        }


class LabelEncoder:
    def __init__(self, num_cls):
        self._num_cls = num_cls

    def get_num_cls(self):
        return self._num_cls


# ---------------------------------------------------------------------------
if __name__ == "__main__":
    root = jax.random.PRNGKey(0)
    k_scale, k_emb, k_x1, k_x2 = jax.random.split(root, 4)

    data_info = DataInfo()
    label_encoder_dict = {'category': LabelEncoder(num_cls=5)}
    d_model = 32
    B, L = 2, 8

    # --- scaling column: Linear(32,32) -> Linear(32,1) ----------------------
    mod_scaling = TemporalOutput('price', data_info, label_encoder_dict, d_model, k_scale)
    x1 = jax.random.normal(k_x1, (B, L, d_model), jnp.float32)
    y1 = mod_scaling('price', x1)

    # --- embedding column: Linear(32,32) -> Linear(32,num_cls=5) ------------
    mod_emb = TemporalOutput('category', data_info, label_encoder_dict, d_model, k_emb)
    x2 = jax.random.normal(k_x2, (B, L, d_model), jnp.float32)
    y2 = mod_emb('category', x2)

    jax.block_until_ready((y1, y2))

    assert y1.shape == (B, L, 1)
    assert y2.shape == (B, L, 5)

    # Pure-JAX reference check (same math, un-fused).
    def ref(x, m):
        h = x.reshape(-1, m.d_model) @ m.w1 + m.b1
        y = h @ m.w2 + m.b2
        return y.reshape(x.shape[:-1] + (m.d_out,))

    np.testing.assert_allclose(np.asarray(y1), np.asarray(ref(x1, mod_scaling)),
                               rtol=1e-2, atol=1e-2)
    np.testing.assert_allclose(np.asarray(y2), np.asarray(ref(x2, mod_emb)),
                               rtol=1e-2, atol=1e-2)

    print("KERNEL_OK")
</pallas_src>

<mosaic_0001>
module attributes {stable_mosaic.version = 11 : i64} {
  func.func @_two_layer_kernel(%arg0: i32, %arg1: memref<16x32xf32, #tpu.memory_space<vmem>>, %arg2: memref<32x32xf32, #tpu.memory_space<vmem>>, %arg3: memref<1x32xf32, #tpu.memory_space<vmem>>, %arg4: memref<32x128xf32, #tpu.memory_space<vmem>>, %arg5: memref<1x128xf32, #tpu.memory_space<vmem>>, %arg6: memref<16x128xf32, #tpu.memory_space<vmem>>) attributes {dimension_semantics = [#tpu.dimension_semantics<parallel>], iteration_bounds = array<i64: 1>, scalar_prefetch = 0 : i64, scratch_operands = 0 : i64, tpu.core_type = #tpu.core_type<tc>, window_params = [{transform_indices = @transform_0, window_bounds = array<i64: 16, 32>}, {pipeline_mode = #tpu.pipeline_mode<synchronous>, transform_indices = @transform_1, window_bounds = array<i64: 32, 32>}, {pipeline_mode = #tpu.pipeline_mode<synchronous>, transform_indices = @transform_2, window_bounds = array<i64: 1, 32>}, {pipeline_mode = #tpu.pipeline_mode<synchronous>, transform_indices = @transform_3, window_bounds = array<i64: 32, 128>}, {pipeline_mode = #tpu.pipeline_mode<synchronous>, transform_indices = @transform_4, window_bounds = array<i64: 1, 128>}, {transform_indices = @transform_5, window_bounds = array<i64: 16, 128>}]} {
    %c0 = arith.constant 0 : index
    %c0_0 = arith.constant 0 : index
    %0 = vector.load %arg1[%c0, %c0_0] : memref<16x32xf32, #tpu.memory_space<vmem>>, vector<16x32xf32>
    %c0_1 = arith.constant 0 : index
    %c0_2 = arith.constant 0 : index
    %1 = vector.load %arg2[%c0_1, %c0_2] : memref<32x32xf32, #tpu.memory_space<vmem>>, vector<32x32xf32>
    %cst = arith.constant dense<0.000000e+00> : vector<16x32xf32>
    %2 = tpu.matmul %0, %1, %cst {dimension_numbers = #tpu.dot_dimension_numbers<[1], [0], [0], [1], [0, 0, 1, 1], [], []>} : vector<16x32xf32>, vector<32x32xf32>, vector<16x32xf32> -> vector<16x32xf32>
    %c0_3 = arith.constant 0 : index
    %c0_4 = arith.constant 0 : index
    %3 = vector.load %arg3[%c0_3, %c0_4] : memref<1x32xf32, #tpu.memory_space<vmem>>, vector<1x32xf32>
    %4 = vector.broadcast %3 : vector<1x32xf32> to vector<16x32xf32>
    %5 = arith.addf %2, %4 : vector<16x32xf32>
    %c0_5 = arith.constant 0 : index
    %c0_6 = arith.constant 0 : index
    %6 = vector.load %arg4[%c0_5, %c0_6] : memref<32x128xf32, #tpu.memory_space<vmem>>, vector<32x128xf32>
    %cst_7 = arith.constant dense<0.000000e+00> : vector<16x128xf32>
    %7 = tpu.matmul %5, %6, %cst_7 {dimension_numbers = #tpu.dot_dimension_numbers<[1], [0], [0], [1], [0, 0, 1, 1], [], []>} : vector<16x32xf32>, vector<32x128xf32>, vector<16x128xf32> -> vector<16x128xf32>
    %c0_8 = arith.constant 0 : index
    %c0_9 = arith.constant 0 : index
    %8 = vector.load %arg5[%c0_8, %c0_9] : memref<1x128xf32, #tpu.memory_space<vmem>>, vector<1x128xf32>
    %9 = vector.broadcast %8 : vector<1x128xf32> to vector<16x128xf32>
    %10 = arith.addf %7, %9 : vector<16x128xf32>
    %c0_10 = arith.constant 0 : index
    %c0_11 = arith.constant 0 : index
    %11 = vector.load %arg6[%c0_10, %c0_11] : memref<16x128xf32, #tpu.memory_space<vmem>>, vector<16x128xf32>
    tpu.vector_store %arg6[%c0_10, %c0_11], %10 {strides = array<i32>} : memref<16x128xf32, #tpu.memory_space<vmem>>, vector<16x128xf32>,
    return
  }
  func.func @transform_0(%arg0: i32) -> (i32, i32) {
    %c0_i32 = arith.constant 0 : i32
    %c0_i32_0 = arith.constant 0 : i32
    return %arg0, %c0_i32 : i32, i32
  }
  func.func @transform_1(%arg0: i32) -> (i32, i32) {
    %c0_i32 = arith.constant 0 : i32
    %c0_i32_0 = arith.constant 0 : i32
    %c0_i32_1 = arith.constant 0 : i32
    return %c0_i32, %c0_i32_0 : i32, i32
  }
  func.func @transform_2(%arg0: i32) -> (i32, i32) {
    %c0_i32 = arith.constant 0 : i32
    %c0_i32_0 = arith.constant 0 : i32
    %c0_i32_1 = arith.constant 0 : i32
    return %c0_i32, %c0_i32_0 : i32, i32
  }
  func.func @transform_3(%arg0: i32) -> (i32, i32) {
    %c0_i32 = arith.constant 0 : i32
    %c0_i32_0 = arith.constant 0 : i32
    %c0_i32_1 = arith.constant 0 : i32
    return %c0_i32, %c0_i32_0 : i32, i32
  }
  func.func @transform_4(%arg0: i32) -> (i32, i32) {
    %c0_i32 = arith.constant 0 : i32
    %c0_i32_0 = arith.constant 0 : i32
    %c0_i32_1 = arith.constant 0 : i32
    return %c0_i32, %c0_i32_0 : i32, i32
  }
  func.func @transform_5(%arg0: i32) -> (i32, i32) {
    %c0_i32 = arith.constant 0 : i32
    %c0_i32_0 = arith.constant 0 : i32
    return %arg0, %c0_i32 : i32, i32
  }
}

</mosaic_0001>

<bundles_post_ra>
// kernel: tpu_custom_call.1
= control target key start
LH: loop header
LB: loop body
LE: loop exit
PB: predicated region body
PF: predicated region fallthrough
CT: control target
= control target key end

     0   :  { %10 = vsyncpa [#allocation3], 0  ;;  %s630_s0 = inlined_call_operand.hbm [shape: f32[16,32], index: 0, kind: input, shape index: {}]   ;;  %s631_s1 = inlined_call_operand.hbm [shape: f32[32,32], index: 1, kind: input, shape index: {}]   ;;  %s632_s2 = inlined_call_operand.hbm [shape: f32[1,32], index: 2, kind: input, shape index: {}]   ;;  %s633_s3 = inlined_call_operand.hbm [shape: f32[32,128], index: 3, kind: input, shape index: {}]   ;;  %s634_s4 = inlined_call_operand.hbm [shape: f32[1,128], index: 4, kind: input, shape index: {}]   ;;  %s635_s5 = inlined_call_operand.hbm [shape: f32[16,128], index: 5, kind: output, shape index: {}]  }
   0x1   :  { %11 = vsyncpa [#allocation6], 0 }
   0x2   :  { %12 = vsyncpa [#allocation9], 0 }
   0x3   :  { %13 = vsyncpa [#allocation4], 0  ;;  %s497_s18 = smov [#allocation5]   ;;  %s498_s20 = smov [#allocation8]  }
   0x4   :  { %s31_s19 = sshll.u32 %s497_s18, 4  ;;  %s53_s21 = sshll.u32 %s498_s20, 4  ;;  %s32_s19 = int_to_ptr.vmem [resolvable:$true] %s31_s19  ;;  %s535_s21 = int_to_ptr.vmem [resolvable:$true] %s53_s21 }
   0x5   :  { %s357_s24 = scalar_lea.hbm %s631_s1, 512 }
   0x6   :  { %p358_p0 = scmp.ne.s32.totalorder %s631_s1, %s357_s24  ;;  %p361_p1 = scmp.lt.u32.totalorder %s357_s24, %s631_s1 }
   0x8   :  { %p363_p2 = pnand %p361_p1, %p358_p0 }
   0xa   :  { %366 = shalt.err (!%p363_p2)
}
   0xb   :  { %s367_s29 = scalar_lea.vmem %s32_s19, 512  ;;  %p372_p4 = scmp.lt.s32.totalorder %s32_s19, %s32_s19 }
   0xc   :  { %p368_p3 = scmp.ne.s32.totalorder %s32_s19, %s367_s29  ;;  %p373_p5 = scmp.lt.s32.totalorder %s367_s29, %s367_s29 }
   0xe   :  { %p374_p6 = por %p373_p5, %p372_p4 }
  0x10   :  { %p375_p7 = pnand %p374_p6, %p368_p3 }
  0x12   :  { %378 = shalt.err (!%p375_p7)
}
  0x13   :  { %s499_s30 = smov 128   ;;  %s500_s6 = smov 8  }
  0x14   :  { %37 = dma.hbm_to_vmem [thread:$0]  %s631_s1, 512, %s32_s19, [#allocation6], %s499_s30, %s499_s30, %s500_s6  }
  0x15   :  { %s379_s11 = scalar_lea.hbm %s633_s3, 512 }
  0x16   :  { %p380_p8 = scmp.ne.s32.totalorder %s633_s3, %s379_s11  ;;  %p383_p9 = scmp.lt.u32.totalorder %s379_s11, %s633_s3 }
  0x18   :  { %p385_p10 = pnand %p383_p9, %p380_p8 }
  0x1a   :  { %388 = shalt.err (!%p385_p10)
}
  0x1b   :  { %s389_s16 = scalar_lea.vmem %s535_s21, 512  ;;  %p394_p12 = scmp.lt.s32.totalorder %s535_s21, %s535_s21 }
  0x1c   :  { %p390_p11 = scmp.ne.s32.totalorder %s535_s21, %s389_s16  ;;  %p395_p13 = scmp.lt.s32.totalorder %s389_s16, %s389_s16 }
  0x1e   :  { %p396_p0 = por %p395_p13, %p394_p12 }
  0x20   :  { %p397_p1 = pnand %p396_p0, %p390_p11 }
  0x22   :  { %400 = shalt.err (!%p397_p1)
}
  0x23   :  { %59 = dma.hbm_to_vmem [thread:$0]  %s633_s3, 512, %s535_s21, [#allocation9], %s499_s30, %s499_s30, %s500_s6  }
  0x24   :  { %s501_s18 = smov [#allocation2]   ;;  %s502_s20 = smov [#allocation7]  }
  0x25   :  { %s19_s19 = sshll.u32 %s501_s18, 4  ;;  %s44_s22 = sshll.u32 %s502_s20, 4  ;;  %s20_s19 = int_to_ptr.vmem [resolvable:$true] %s19_s19  ;;  %s45_s22 = int_to_ptr.vmem [resolvable:$true] %s44_s22 }
  0x26   :  { %s401_s25 = scalar_lea.hbm %s630_s0, 256 }
  0x27   :  { %p402_p2 = scmp.ne.s32.totalorder %s630_s0, %s401_s25  ;;  %p405_p3 = scmp.lt.u32.totalorder %s401_s25, %s630_s0 }
  0x29   :  { %p407_p4 = pnand %p405_p3, %p402_p2 }
  0x2b   :  { %410 = shalt.err (!%p407_p4)
}
  0x2c   :  { %s411_s3 = scalar_lea.vmem %s20_s19, 256  ;;  %p416_p6 = scmp.lt.s32.totalorder %s20_s19, %s20_s19 }
  0x2d   :  { %p412_p5 = scmp.ne.s32.totalorder %s20_s19, %s411_s3  ;;  %p417_p7 = scmp.lt.s32.totalorder %s411_s3, %s411_s3 }
  0x2f   :  { %p418_p8 = por %p417_p7, %p416_p6 }
  0x31   :  { %p419_p9 = pnand %p418_p8, %p412_p5 }
  0x33   :  { %422 = shalt.err (!%p419_p9)
}
  0x34   :  { %25 = dma.hbm_to_vmem [thread:$0]  %s630_s0, 256, %s20_s19, [#allocation3], %s499_s30, %s499_s30, %s500_s6  }
  0x35   :  { %s423_s10 = scalar_lea.hbm %s632_s2, 16 }
  0x36   :  { %p424_p10 = scmp.ne.s32.totalorder %s632_s2, %s423_s10  ;;  %p427_p11 = scmp.lt.u32.totalorder %s423_s10, %s632_s2 }
  0x38   :  { %p429_p12 = pnand %p427_p11, %p424_p10 }
  0x3a   :  { %432 = shalt.err (!%p429_p12)
}
  0x3b   :  { %s433_s15 = scalar_lea.vmem %s45_s22, 16  ;;  %s437_s16 = scalar_lea.vmem %s45_s22, 32 }
  0x3c   :  { %p434_p13 = scmp.ne.s32.totalorder %s45_s22, %s433_s15  ;;  %p438_p0 = scmp.lt.s32.totalorder %s45_s22, %s45_s22 }
  0x3d   :  { %p439_p1 = scmp.lt.s32.totalorder %s437_s16, %s433_s15 }
  0x3f   :  { %p440_p2 = por %p439_p1, %p438_p0 }
  0x41   :  { %p441_p3 = pnand %p440_p2, %p434_p13 }
  0x43   :  { %444 = shalt.err (!%p441_p3)
}
  0x44   :  { %47 = dma.hbm_to_vmem [thread:$0]  %s632_s2, 16, %s45_s22, [#allocation6]  }
  0x45   :  { %s503_s17 = smov [#allocation10]   ;;  %s445_s23 = scalar_lea.hbm %s634_s4, 16 }
  0x46   :  { %s66_s18 = sshll.u32 %s503_s17, 4  ;;  %p446_p4 = scmp.ne.s32.totalorder %s634_s4, %s445_s23  ;;  %s67_s18 = int_to_ptr.vmem [resolvable:$true] %s66_s18 }
  0x47   :  { %p449_p5 = scmp.lt.u32.totalorder %s445_s23, %s634_s4 }
  0x49   :  { %p451_p6 = pnand %p449_p5, %p446_p4 }
  0x4b   :  { %454 = shalt.err (!%p451_p6)
}
  0x4c   :  { %s455_s28 = scalar_lea.vmem %s67_s18, 16  ;;  %s459_s2 = scalar_lea.vmem %s67_s18, 32 }
  0x4d   :  { %p456_p7 = scmp.ne.s32.totalorder %s67_s18, %s455_s28  ;;  %p460_p8 = scmp.lt.s32.totalorder %s67_s18, %s67_s18 }
  0x4e   :  { %p461_p9 = scmp.lt.s32.totalorder %s459_s2, %s455_s28 }
  0x50   :  { %p462_p10 = por %p461_p9, %p460_p8 }
  0x52   :  { %p463_p11 = pnand %p462_p10, %p456_p7 }
  0x54   :  { %466 = shalt.err (!%p463_p11)
}
  0x55   :  { %69 = dma.hbm_to_vmem [thread:$0]  %s634_s4, 16, %s67_s18, [#allocation9]  }
  0x56   :  { %489 = dma.done.wait [#allocation3], 256  }
  0x57   :  { %490 = vsyncadd [#allocation3], 4294967040 }
  0x58   :  { %491 = dma.done.wait [#allocation6], 528  }
  0x59   :  { %492 = vsyncadd [#allocation6], 4294966768 }
  0x5a   :  { %493 = dma.done.wait [#allocation9], 528  }
  0x5b   :  { %494 = vsyncadd [#allocation9], 4294966768  ;;  %vm98_vm0 = vcmask 261120   ;;  %v87_v0 = vld [vmem:[#allocation5] sm:$0xff]  ;;  %v88_v1 = vld [vmem:[#allocation5 + $0x8] sm:$0xff]  ;;  %s504_s4 = smov [#allocation11]  }
  0x5c   :  { %v89_v2 = vld [vmem:[#allocation5 + $0x10] sm:$0xff]  ;;  %v333_v3 = vpack.c.bf16 %v88_v1, %v87_v0  ;;  %v90_v4 = vld [vmem:[#allocation5 + $0x18] sm:$0xff]  ;;  %v180_v7 = vld [vmem:[#allocation8] sm:$0xff]  ;;  %s279_s3 = sshll.u32 %s504_s4, 4  ;;  %s280_s3 = int_to_ptr.vmem [resolvable:$true] %s279_s3 }
  0x5d   :  { %v85_v5 = vld [vmem:[#allocation2] sm:$0xff]  ;;  %v337_v6 = vpack.c.bf16 %v90_v4, %v89_v2  ;;  %v86_v10 = vld [vmem:[#allocation2 + $0x8] sm:$0xff]  ;;  %v293_v14 = vld [vmem:[#allocation7] ss:$0 sm:$0xff]  ;;  %s467_s21 = scalar_lea.vmem %s280_s3, 256  ;;  %p472_p13 = scmp.lt.s32.totalorder %s280_s3, %s280_s3 }
  0x5e   :  { %319 = vmatprep.mubr.msk.f32.mxu0 %vm98_vm0, %v85_v5  ;;  %v181_v8 = vld [vmem:[#allocation8 + $0x8] sm:$0xff]  ;;  %334 = vmatprep.subr.bf16.mxu0 %v333_v3  ;;  %v182_v11 = vld [vmem:[#allocation8 + $0x10] sm:$0xff]  ;;  %v183_v12 = vld [vmem:[#allocation8 + $0x18] sm:$0xff]  ;;  %p468_p12 = scmp.ne.s32.totalorder %s280_s3, %s467_s21  ;;  %p473_p0 = scmp.lt.s32.totalorder %s467_s21, %s467_s21 }
  0x5f   :  { %v341_v9 = vpack.c.bf16 %v181_v8, %v180_v7  ;;  %336 = vmatpush3.bf16.msra.mxu0 %v333_v3  ;;  %v345_v13 = vpack.c.bf16 %v183_v12, %v182_v11  ;;  %v296_v19 = vld [vmem:[#allocation10] ss:$0 sm:$0xff] }
  0x60   :  { %338 = vmatprep.subr.bf16.mxu0 %v337_v6  ;;  %p474_p1 = por %p473_p0, %p472_p13 }
  0x61   :  { %342 = vmatprep.subr.bf16.mxu1 %v341_v9 }
  0x62   :  { %344 = vmatpush3.bf16.msra.mxu1 %v341_v9  ;;  %p475_p2 = pnand %p474_p1, %p468_p12 }
  0x63   :  { %340 = vmatpush3.bf16.msra.mxu0 %v337_v6  ;;  %346 = vmatprep.subr.bf16.mxu1 %v345_v13 }
  0x66   :  { %320 = vmatmul.mubr.msk.f32.vlgmr.msra.gmra.mrb[0].mxu0 %vm98_vm0, %v86_v10  ;;  %348 = vmatpush3.bf16.msra.mxu1 %v345_v13 }
 0x139   :  { %v321_v15 = vpop.f32.mrb[0].mxu0 }
 0x13a   :  { %v171_v16 = vpop.f32.mrb[1].mxu0  ;;  %v177_v18 = vadd.f32 %v321_v15, %v293_v14 }
 0x13b   :  { %v172_v17 = vadd.f32 %v293_v14, %v171_v16 }
 0x13d   :  { %330 = vmatprep.mubr.msk.f32.mxu1 %vm98_vm0, %v172_v17 }
 0x13e   :  { %331 = vmatmul.mubr.msk.f32.vlgmr.msra.gmra.mrb[0].mxu1 %vm98_vm0, %v177_v18 }
 0x211   :  { %v332_v20 = vpop.f32.mrb[0].mxu1 }
 0x212   :  { %v269_v21 = vadd.f32 %v332_v20, %v296_v19  ;;  %v263_v22 = vpop.f32.mrb[1].mxu1 }
 0x213   :  { %v264_v23 = vadd.f32 %v296_v19, %v263_v22 }
 0x214   :  { %273 = vst [vmem:[#allocation11 + $0x8] sm:$0xff] %v269_v21 }
 0x215   :  { %272 = vst [vmem:[#allocation11] sm:$0xff] %v264_v23 }
 0x216   :  { %478 = shalt.err (!%p475_p2)
}
 0x217   :  { %s479_s9 = scalar_lea.hbm %s635_s5, 256 }
 0x218   :  { %p480_p3 = scmp.ne.s32.totalorder %s635_s5, %s479_s9  ;;  %p483_p4 = scmp.lt.u32.totalorder %s479_s9, %s635_s5 }
 0x21a   :  { %p485_p5 = pnand %p483_p4, %p480_p3 }
 0x21c   :  { %488 = shalt.err (!%p485_p5)
}
 0x21d   :  { %285 = dma.vmem_to_hbm [thread:$0]  %s280_s3, 256, %s635_s5, [#allocation4], %s499_s30, %s499_s30, %s500_s6  }
 0x21e   :  { %495 = dma.done.wait [#allocation4], 256  }
 0x21f   :  { %496 = vsyncadd [#allocation4], 4294967040 }
 0x220   :  { %289 = vsyncpa [#allocation3], 1 }
 0x221   :  { %290 = vsyncpa [#allocation6], 1 }
 0x222   :  { %291 = vsyncpa [#allocation9], 1 }
 0x223   :  { %292 = vsyncpa [#allocation4], 1 }

</bundles_post_ra>
